<compile_context>
chip_gen: v6e
topology: v6e:2x2x1
jax: 0.10.0
libtpu: 0.0.40
codegen_flags: <defaults>
</compile_context>

<pallas_src>
import functools
import math

import jax
import jax.numpy as jnp
from jax.experimental import pallas as pl
from jax.experimental.pallas import tpu as pltpu

_LANES = 128
_MAX_BLOCK_ROWS = 2048      # 2048 x 128 x 4 B = 1 MiB per f32 operand block


def _noise_kernel(x_ref, bits_ref, o_ref, *, sigma):
    """out = x * (1 + sigma * N(0,1)); Box-Muller using both cos & sin."""
    half = x_ref.shape[0] // 2
    inv24 = jnp.float32(1.0 / (1 << 24))
    mask24 = 0x00FFFFFF  # low 24 random bits

    # One 32-bit draw per element -> u1 in (0, 1], u2 in [0, 1).
    b1 = bits_ref[:half, :] & mask24
    b2 = bits_ref[half:, :] & mask24
    u1 = (b1.astype(jnp.float32) + 1.0) * inv24
    u2 = b2.astype(jnp.float32) * inv24

    # Box-Muller; sigma folded into the radius (distribution is symmetric).
    r = jnp.sqrt(jnp.float32(-2.0 * sigma * sigma) * jnp.log(u1))
    theta = jnp.float32(2.0 * math.pi) * u2
    z_top = r * jnp.cos(theta)
    z_bot = r * jnp.sin(theta)

    x_top = x_ref[:half, :].astype(jnp.float32)
    x_bot = x_ref[half:, :].astype(jnp.float32)
    o_ref[:half, :] = (x_top * (1.0 + z_top)).astype(o_ref.dtype)
    o_ref[half:, :] = (x_bot * (1.0 + z_bot)).astype(o_ref.dtype)


def noise_layer(x, key, *, sigma=0.1, training=True, is_relative_detach=True,
                block_rows=_MAX_BLOCK_ROWS):
    """JAX/Pallas equivalent of NoiseLayer.forward.

    Args:
      x: float array, any shape (NCHW [B, C, H, W] in the original module).
      key: jax.random key; controls the sampled noise (deterministic per key).
    """
    del is_relative_detach  # forward value identical; only grads differ.
    if (not training) or sigma == 0.0:
        return x

    orig_shape = x.shape
    orig_dtype = x.dtype
    total = x.size

    # Lane-dense [rows, 128] slab, tiled along rows.
    rows = pl.cdiv(total, _LANES)
    br = max(16, min(int(block_rows), rows))
    br = ((br + 15) // 16) * 16            # even halves, (8, 128) aligned
    padded_rows = pl.cdiv(rows, br) * br
    padded_total = padded_rows * _LANES

    xf = jnp.ravel(x)
    if padded_total != total:
        xf = jnp.pad(xf, (0, padded_total - total))
    x2 = xf.reshape(padded_rows, _LANES)

    # One 32-bit uniform draw per element; every tile gets distinct bits.
    bits = jax.random.bits(key, shape=x2.shape, dtype=jnp.uint32)
    bits = jax.lax.bitcast_convert_type(bits, jnp.int32)

    grid = (padded_rows // br,)
    out2 = pl.pallas_call(
        functools.partial(_noise_kernel, sigma=float(sigma)),
        out_shape=jax.ShapeDtypeStruct(x2.shape, x2.dtype),
        grid=grid,
        in_specs=[
            pl.BlockSpec((br, _LANES), lambda i: (i, 0)),
            pl.BlockSpec((br, _LANES), lambda i: (i, 0)),
        ],
        out_specs=pl.BlockSpec((br, _LANES), lambda i: (i, 0)),
        compiler_params=pltpu.CompilerParams(
            dimension_semantics=("parallel",),
        ),
    )(x2, bits)

    return out2.reshape(-1)[:total].reshape(orig_shape).astype(orig_dtype)


def _standardized_noise(out, x, sigma):
    """Recover z ~ N(0,1) from out = x * (1 + sigma * z), guarding x == 0."""
    denom = sigma * x
    safe = jnp.where(denom == 0, 1.0, denom)
    return jnp.where(denom == 0, 0.0, (out - x) / safe)


if __name__ == "__main__":
    root = jax.random.PRNGKey(0)
    k_x, k_noise, k_x2, k_noise2 = jax.random.split(root, 4)

    # NCHW feature map: batch=2, channels=4, spatial=16x16.
    x = jax.random.normal(k_x, (2, 4, 16, 16), dtype=jnp.float32)

    # Training mode: adds relative Gaussian noise.
    out_train = jax.block_until_ready(
        noise_layer(x, k_noise, sigma=0.1, training=True))
    assert out_train.shape == x.shape and out_train.dtype == x.dtype

    # Eval mode: identity.
    out_eval = jax.block_until_ready(
        noise_layer(x, k_noise, sigma=0.1, training=False))
    assert bool(jnp.all(out_eval == x))

    # Noise is relative and standard-normal after removing sigma * x.
    z = _standardized_noise(out_train, x, 0.1)
    assert bool(jnp.isfinite(z).all())
    assert abs(float(jnp.mean(z))) < 0.2
    assert 0.7 < float(jnp.std(z)) < 1.3

    # Multi-tile path (small block forces a grid of several tiles).
    x_big = jax.random.normal(k_x2, (2, 4, 32, 32), dtype=jnp.float32)
    out_big = jax.block_until_ready(
        noise_layer(x_big, k_noise2, sigma=0.1, training=True, block_rows=16))
    zb = _standardized_noise(out_big, x_big, 0.1)
    assert bool(jnp.isfinite(zb).all())
    assert 0.8 < float(jnp.std(zb)) < 1.2

    print("KERNEL_OK")
</pallas_src>

<mosaic_0001>
module attributes {stable_mosaic.version = 11 : i64} {
  func.func @_noise_kernel(%arg0: i32, %arg1: memref<16x128xf32, #tpu.memory_space<vmem>>, %arg2: memref<16x128xi32, #tpu.memory_space<vmem>>, %arg3: memref<16x128xf32, #tpu.memory_space<vmem>>) attributes {dimension_semantics = [#tpu.dimension_semantics<parallel>], iteration_bounds = array<i64: 1>, scalar_prefetch = 0 : i64, scratch_operands = 0 : i64, tpu.core_type = #tpu.core_type<tc>, window_params = [{transform_indices = @transform_0, window_bounds = array<i64: 16, 128>}, {transform_indices = @transform_1, window_bounds = array<i64: 16, 128>}, {transform_indices = @transform_2, window_bounds = array<i64: 16, 128>}]} {
    %c0 = arith.constant 0 : index
    %c0_0 = arith.constant 0 : index
    %0 = vector.load %arg2[%c0, %c0_0] : memref<16x128xi32, #tpu.memory_space<vmem>>, vector<8x128xi32>
    %c16777215_i32 = arith.constant 16777215 : i32
    %1 = vector.broadcast %c16777215_i32 : i32 to vector<8x128xi32>
    %2 = arith.andi %0, %1 : vector<8x128xi32>
    %c8 = arith.constant 8 : index
    %c0_1 = arith.constant 0 : index
    %3 = vector.load %arg2[%c8, %c0_1] : memref<16x128xi32, #tpu.memory_space<vmem>>, vector<8x128xi32>
    %c16777215_i32_2 = arith.constant 16777215 : i32
    %4 = vector.broadcast %c16777215_i32_2 : i32 to vector<8x128xi32>
    %5 = arith.andi %3, %4 : vector<8x128xi32>
    %6 = arith.sitofp %2 : vector<8x128xi32> to vector<8x128xf32>
    %cst = arith.constant 1.000000e+00 : f32
    %7 = vector.broadcast %cst : f32 to vector<8x128xf32>
    %8 = arith.addf %6, %7 : vector<8x128xf32>
    %cst_3 = arith.constant 5.96046448E-8 : f32
    %9 = vector.broadcast %cst_3 : f32 to vector<8x128xf32>
    %10 = arith.mulf %8, %9 : vector<8x128xf32>
    %11 = arith.sitofp %5 : vector<8x128xi32> to vector<8x128xf32>
    %cst_4 = arith.constant 5.96046448E-8 : f32
    %12 = vector.broadcast %cst_4 : f32 to vector<8x128xf32>
    %13 = arith.mulf %11, %12 : vector<8x128xf32>
    %14 = math.log %10 : vector<8x128xf32>
    %cst_5 = arith.constant -2.000000e-02 : f32
    %15 = vector.broadcast %cst_5 : f32 to vector<8x128xf32>
    %16 = arith.mulf %15, %14 : vector<8x128xf32>
    %17 = math.sqrt %16 : vector<8x128xf32>
    %cst_6 = arith.constant 6.28318548 : f32
    %18 = vector.broadcast %cst_6 : f32 to vector<8x128xf32>
    %19 = arith.mulf %18, %13 : vector<8x128xf32>
    %20 = math.cos %19 : vector<8x128xf32>
    %21 = arith.mulf %17, %20 : vector<8x128xf32>
    %22 = math.sin %19 : vector<8x128xf32>
    %23 = arith.mulf %17, %22 : vector<8x128xf32>
    %c0_7 = arith.constant 0 : index
    %c0_8 = arith.constant 0 : index
    %24 = vector.load %arg1[%c0_7, %c0_8] : memref<16x128xf32, #tpu.memory_space<vmem>>, vector<8x128xf32>
    %c8_9 = arith.constant 8 : index
    %c0_10 = arith.constant 0 : index
    %25 = vector.load %arg1[%c8_9, %c0_10] : memref<16x128xf32, #tpu.memory_space<vmem>>, vector<8x128xf32>
    %cst_11 = arith.constant 1.000000e+00 : f32
    %26 = vector.broadcast %cst_11 : f32 to vector<8x128xf32>
    %27 = arith.addf %26, %21 : vector<8x128xf32>
    %28 = arith.mulf %24, %27 : vector<8x128xf32>
    %c0_12 = arith.constant 0 : index
    %c0_13 = arith.constant 0 : index
    %29 = vector.load %arg3[%c0_12, %c0_13] : memref<16x128xf32, #tpu.memory_space<vmem>>, vector<8x128xf32>
    tpu.vector_store %arg3[%c0_12, %c0_13], %28 {strides = array<i32>} : memref<16x128xf32, #tpu.memory_space<vmem>>, vector<8x128xf32>,
    %cst_14 = arith.constant 1.000000e+00 : f32
    %30 = vector.broadcast %cst_14 : f32 to vector<8x128xf32>
    %31 = arith.addf %30, %23 : vector<8x128xf32>
    %32 = arith.mulf %25, %31 : vector<8x128xf32>
    %c8_15 = arith.constant 8 : index
    %c0_16 = arith.constant 0 : index
    %33 = vector.load %arg3[%c8_15, %c0_16] : memref<16x128xf32, #tpu.memory_space<vmem>>, vector<8x128xf32>
    tpu.vector_store %arg3[%c8_15, %c0_16], %32 {strides = array<i32>} : memref<16x128xf32, #tpu.memory_space<vmem>>, vector<8x128xf32>,
    return
  }
  func.func @transform_0(%arg0: i32) -> (i32, i32) {
    %c0_i32 = arith.constant 0 : i32
    %c0_i32_0 = arith.constant 0 : i32
    return %arg0, %c0_i32 : i32, i32
  }
  func.func @transform_1(%arg0: i32) -> (i32, i32) {
    %c0_i32 = arith.constant 0 : i32
    %c0_i32_0 = arith.constant 0 : i32
    return %arg0, %c0_i32 : i32, i32
  }
  func.func @transform_2(%arg0: i32) -> (i32, i32) {
    %c0_i32 = arith.constant 0 : i32
    %c0_i32_0 = arith.constant 0 : i32
    return %arg0, %c0_i32 : i32, i32
  }
}

</mosaic_0001>

<bundles_post_ra>
// kernel: tpu_custom_call.1
= control target key start
LH: loop header
LB: loop body
LE: loop exit
PB: predicated region body
PF: predicated region fallthrough
CT: control target
= control target key end

     0   :  { %7 = vsyncpa [#allocation3], 0  ;;  %s457_s0 = inlined_call_operand.hbm [shape: f32[16,128], index: 0, kind: input, shape index: {}]   ;;  %s458_s1 = inlined_call_operand.hbm [shape: s32[16,128], index: 1, kind: input, shape index: {}]   ;;  %s459_s2 = inlined_call_operand.hbm [shape: f32[16,128], index: 2, kind: output, shape index: {}]  }
   0x1   :  { %8 = vsyncpa [#allocation6], 0 }
   0x2   :  { %9 = vsyncpa [#allocation4], 0  ;;  %s392_s9 = smov [#allocation2]  }
   0x3   :  { %s15_s10 = sshll.u32 %s392_s9, 4  ;;  %s16_s10 = int_to_ptr.vmem [resolvable:$true] %s15_s10 }
   0x4   :  { %s334_s11 = scalar_lea.vmem %s16_s10, 256  ;;  %p339_p1 = scmp.lt.s32.totalorder %s16_s10, %s16_s10 }
   0x5   :  { %p335_p0 = scmp.ne.s32.totalorder %s16_s10, %s334_s11  ;;  %p340_p2 = scmp.lt.s32.totalorder %s334_s11, %s334_s11 }
   0x7   :  { %p341_p3 = por %p340_p2, %p339_p1 }
   0x9   :  { %p342_p4 = pnand %p341_p3, %p335_p0 }
   0xb   :  { %345 = shalt.err (!%p342_p4)
}
   0xc   :  { %s393_s12 = smov 128   ;;  %s394_s13 = smov 8  }
   0xd   :  { %21 = dma.hbm_to_vmem [thread:$0]  %s457_s0, 256, %s16_s10, [#allocation3], %s393_s12, %s393_s12, %s394_s13  }
   0xe   :  { %s395_s16 = smov [#allocation5]  }
   0xf   :  { %s27_s17 = sshll.u32 %s395_s16, 4  ;;  %s28_s17 = int_to_ptr.vmem [resolvable:$true] %s27_s17 }
  0x10   :  { %s354_s18 = scalar_lea.vmem %s28_s17, 256  ;;  %p359_p6 = scmp.lt.s32.totalorder %s28_s17, %s28_s17 }
  0x11   :  { %p355_p5 = scmp.ne.s32.totalorder %s28_s17, %s354_s18  ;;  %p360_p7 = scmp.lt.s32.totalorder %s354_s18, %s354_s18 }
  0x13   :  { %p361_p8 = por %p360_p7, %p359_p6 }
  0x15   :  { %p362_p9 = pnand %p361_p8, %p355_p5 }
  0x17   :  { %365 = shalt.err (!%p362_p9)
}
  0x18   :  { %33 = dma.hbm_to_vmem [thread:$0]  %s458_s1, 256, %s28_s17, [#allocation6], %s393_s12, %s393_s12, %s394_s13  }
  0x19   :  { %386 = dma.done.wait [#allocation3], 256  }
  0x1a   :  { %387 = vsyncadd [#allocation3], 4294967040 }
  0x1b   :  { %388 = dma.done.wait [#allocation6], 256  }
  0x1c   :  { %389 = vsyncadd [#allocation6], 4294967040  ;;  %v42_v0 = vld [vmem:[#allocation5 + $0x8] sm:$0xff]  ;;  %v396_v15 = vmov 683565275   ;;  %v40_v28 = vld [vmem:[#allocation5] sm:$0xff] }
  0x1d   :  { %v43_v1 = vand.u32 16777215, %v42_v0  ;;  %v397_v17 = vmov 2475754826   ;;  %v398_v19 = vmov 2131351028  }
  0x1e   :  { %v399_v21 = vmov 2102212464   ;;  %v400_v23 = vmov 920167782   ;;  %v401_v32 = vmov 1326507024  }
  0x1f   :  { %v47_v2 = vcvt.s32.f32 %v43_v1  ;;  %v41_v39 = vand.u32 16777215, %v40_v28  ;;  %s402_s0 = smov [#allocation7]  }
  0x20   :  { %s282_s1 = sshll.u32 %s402_s0, 4  ;;  %s283_s1 = int_to_ptr.vmem [resolvable:$true] %s282_s1 }
  0x21   :  { %v48_v3 = vmul.f32 5.9604645e-08, %v47_v2  ;;  %v44_v55 = vcvt.s32.f32 %v41_v39  ;;  %s366_s21 = scalar_lea.vmem %s283_s1, 256  ;;  %p371_p11 = scmp.lt.s32.totalorder %s283_s1, %s283_s1 }
  0x22   :  { %p367_p10 = scmp.ne.s32.totalorder %s283_s1, %s366_s21  ;;  %p372_p12 = scmp.lt.s32.totalorder %s366_s21, %s366_s21 }
  0x23   :  { %v430_v4 = vmul.f32 6.2831855, %v48_v3  ;;  %v45_v60 = vadd.f32 1.0, %v44_v55 }
  0x24   :  { %p373_p13 = por %p372_p12, %p371_p11 }
  0x25   :  { %v63_v5 = vand.u32 2139095040, %v430_v4  ;;  %v60_v8 = vand.u32 2147483647, %v430_v4  ;;  %v46_v63 = vmul.f32 5.9604645e-08, %v45_v60  ;;  %vm62_vm7 = vcmp.lt.s32.totalorder %v430_v4, 0 }
  0x26   :  { %p374_p0 = pnand %p373_p13, %p367_p10 }
  0x27   :  { %v64_v6 = vshrl.u32 %v63_v5, 23  ;;  %v67_v11 = vand.u32 8388607, %v60_v8  ;;  %318 = vlog2.f32 %v46_v63  ;;  %vm61_vm8 = vcmp.le.f32.partialorder %v60_v8, 0.7853982 }
  0x29   :  { %v295_v7 = vadd.s32 4294967169, %v64_v6  ;;  %v68_v25 = vor.u32 8388608, %v67_v11 }
  0x2b   :  { %v70_v9 = vadd.s32 1, %v295_v7  ;;  %v108_v40 = vshll.u32 %v68_v25, 8 }
  0x2d   :  { %vm71_vm0 = vcmp.gt.s32.totalorder %v70_v9, 0 }
  0x2e   :  { %v72_v10 = vsel %vm71_vm0, %v70_v9, 0 }
  0x2f   :  { %v74_v12 = vand.u32 31, %v72_v10  ;;  %v73_v13 = vshrl.u32 %v72_v10, 5 }
  0x31   :  { %v75_v14 = vsub.s32 32, %v74_v12  ;;  %v77_v16 = vshll.u32 %v396_v15, %v74_v12  ;;  %v80_v18 = vshll.u32 %v397_v17, %v74_v12  ;;  %v83_v20 = vshll.u32 %v398_v19, %v74_v12 }
  0x32   :  { %v86_v22 = vshll.u32 %v399_v21, %v74_v12  ;;  %v89_v24 = vshll.u32 %v400_v23, %v74_v12  ;;  %vm92_vm1 = vcmp.lt.s32.totalorder %v73_v13, 1  ;;  %vm95_vm2 = vcmp.lt.s32.totalorder %v73_v13, 4 }
  0x33   :  { %v78_v26 = vshrl.u32 %v397_v17, %v75_v14  ;;  %v81_v27 = vshrl.u32 %v398_v19, %v75_v14  ;;  %v76_v29 = vshrl.u32 %v396_v15, %v75_v14  ;;  %v84_v30 = vshrl.u32 %v399_v21, %v75_v14 }
  0x34   :  { %v87_v31 = vshrl.u32 %v400_v23, %v75_v14  ;;  %v90_v33 = vshrl.u32 %v401_v32, %v75_v14  ;;  %vm94_vm3 = vcmp.lt.s32.totalorder %v73_v13, 3  ;;  %vm93_vm4 = vcmp.lt.s32.totalorder %v73_v13, 2  ;;  %v319_v11 = vpop.eup %318 }
  0x35   :  { %v79_v34 = vor.u32 %v78_v26, %v77_v16  ;;  %v82_v35 = vor.u32 %v81_v27, %v80_v18  ;;  %v85_v36 = vor.u32 %v84_v30, %v83_v20  ;;  %v50_v16 = vmul.f32 0.6931472, %v319_v11 }
  0x36   :  { %v88_v37 = vor.u32 %v87_v31, %v86_v22  ;;  %v91_v38 = vor.u32 %v90_v33, %v89_v24 }
  0x37   :  { %v96_v41 = vsel %vm92_vm1, %v76_v29, %v79_v34  ;;  %v97_v42 = vsel %vm95_vm2, %v85_v36, 2102212464  ;;  %v100_v43 = vsel %vm92_vm1, %v79_v34, %v82_v35  ;;  %v104_v47 = vsel %vm92_vm1, %v82_v35, %v85_v36 }
  0x38   :  { %v101_v44 = vsel %vm95_vm2, %v88_v37, 920167782  ;;  %v98_v45 = vsel %vm94_vm3, %v82_v35, %v97_v42  ;;  %v105_v48 = vsel %vm95_vm2, %v91_v38, 1326507024  ;;  %v51_v21 = vmul.f32 -0.02, %v50_v16 }
  0x39   :  { %v102_v46 = vsel %vm94_vm3, %v85_v36, %v101_v44  ;;  %v106_v50 = vsel %vm94_vm3, %v88_v37, %v105_v48  ;;  %v99_v51 = vsel %vm93_vm4, %v96_v41, %v98_v45  ;;  %vm152_vm1 = vweird.f32 %v430_v4 }
  0x3a   :  { %v103_v49 = vsel %vm93_vm4, %v100_v43, %v102_v46  ;;  %v107_v52 = vsel %vm93_vm4, %v104_v47, %v106_v50  ;;  %v115_v58 = vmul.u32 %v108_v40, %v99_v51  ;;  %320 = vrsqrt.f32 %v51_v21 }
  0x3b   :  { %v436_v53 = vmul.u32.u64.low %v108_v40, %v103_v49  ;;  %v437_v54 = vmul.u32.u64.high %v108_v40, %v103_v49, %v436_v53  ;;  %v439_v56 = vmul.u32.u64.low %v108_v40, %v107_v52  ;;  %v440_v57 = vmul.u32.u64.high %v108_v40, %v107_v52, %v439_v56 }
  0x3c   :  { %vm54_vm9 = vcmp.eq.f32.partialorder %v51_v21, inf  ;;  %vm56_vm10 = vcmp.eq.f32.partialorder %v51_v21, 0.0  ;;  %v57_v38 = vand.u32 2147483648, %v51_v21 }
  0x3d   :  { %v118_v59 = vadd.s32 1, %v437_v54  ;;  %vm117_vm5 = vc.u32 %v440_v57, %v436_v53  ;;  %v116_v10 = vadd.s32 %v436_v53, %v440_v57  ;;  %v269_v53 = vld [vmem:[#allocation2] sm:$0xff] }
  0x3f   :  { %v119_v61 = vsel %vm117_vm5, %v118_v59, %v437_v54  ;;  %v270_v54 = vld [vmem:[#allocation2 + $0x8] sm:$0xff] }
  0x40   :  { %v120_v62 = vadd.s32 %v119_v61, %v115_v58 }
  0x42   :  { %v121_v0 = vadd.s32 536870912, %v120_v62 }
  0x44   :  { %v122_v1 = vshrl.u32 %v121_v0, 30 }
  0x46   :  { %v123_v2 = vshll.u32 %v122_v1, 30  ;;  %v146_v26 = vsub.s32 4, %v122_v1 }
  0x47   :  { %v321_v33 = vpop.eup %320 }
  0x48   :  { %v124_v3 = vsub.s32 %v120_v62, %v123_v2  ;;  %v147_v29 = vsel %vm62_vm7, %v146_v26, %v122_v1  ;;  %v53_v36 = vmul.f32 %v321_v33, %v51_v21 }
  0x49   :  { %v149_v31 = vsel %vm61_vm8, 0, %v147_v29 }
  0x4a   :  { %v126_v5 = vsub.s32 0, %v124_v3  ;;  %v257_v32 = vadd.s32 3, %v149_v31  ;;  %v153_v34 = vand.u32 3, %v149_v31  ;;  %v55_v39 = vsel %vm54_vm9, %v51_v21, %v53_v36 }
  0x4b   :  { %v58_v44 = vsel %vm56_vm10, %v57_v38, %v55_v39 }
  0x4c   :  { %v296_v6 = vmin.u32 %v126_v5, %v124_v3  ;;  %v258_v35 = vand.u32 3, %v257_v32  ;;  %vm158_vm11 = vcmp.eq.s32.totalorder %v153_v34, 2  ;;  %vm155_vm13 = vcmp.eq.s32.totalorder %v153_v34, 0 }
  0x4d   :  { %vm154_vm15 = vcmp.lt.s32.totalorder %v153_v34, 2 }
  0x4e   :  { %v128_v7 = vclz %v296_v6  ;;  %vm263_vm12 = vcmp.eq.s32.totalorder %v258_v35, 2  ;;  %vm260_vm14 = vcmp.eq.s32.totalorder %v258_v35, 0  ;;  %vm259_vm0 = vcmp.lt.s32.totalorder %v258_v35, 2 }
  0x50   :  { %v297_v9 = vadd.s32 4294967294, %v128_v7 }
  0x52   :  { %vm298_vm6 = vcmp.lt.s32.totalorder %v297_v9, 0 }
  0x53   :  { %v131_v12 = vsel %vm298_vm6, 0, %v297_v9 }
  0x54   :  { %v132_v13 = vsub.s32 32, %v131_v12  ;;  %v133_v14 = vshll.u32 %v124_v3, %v131_v12  ;;  %v136_v15 = vsub.s32 4294967266, %v131_v12 }
  0x56   :  { %v134_v17 = vshrl.u32 %v116_v10, %v132_v13  ;;  %v137_v18 = vadd.s32 127, %v136_v15 }
  0x58   :  { %v135_v19 = vor.u32 %v134_v17, %v133_v14  ;;  %v138_v20 = vshll.u32 %v137_v18, 23 }
  0x5a   :  { %v139_v22 = vor.u32 4788187, %v138_v20  ;;  %v142_v23 = vcvt.s32.f32 %v135_v19 }
  0x5c   :  { %v140_v24 = vand.u32 2147483647, %v139_v22 }
  0x5e   :  { %v143_v25 = vmul.f32 %v142_v23, %v140_v24 }
  0x60   :  { %v144_v27 = vxor.u32 2147483648, %v143_v25 }
  0x62   :  { %v145_v28 = vsel %vm62_vm7, %v144_v27, %v143_v25 }
  0x63   :  { %v148_v30 = vsel %vm61_vm8, %v430_v4, %v145_v28 }
  0x64   :  { %322 = vcosq.f32 %v148_v30 }
  0x65   :  { %324 = vsinq.f32 %v148_v30 }
  0x71   :  { %v323_v37 = vpop.eup %322 }
  0x72   :  { %v325_v8 = vpop.eup %324  ;;  %v159_v40 = vxor.u32 2147483648, %v323_v37 }
  0x73   :  { %v156_v41 = vxor.u32 2147483648, %v325_v8 }
  0x74   :  { %v160_v42 = vsel %vm158_vm11, %v159_v40, %v325_v8  ;;  %v265_v43 = vsel %vm263_vm12, %v159_v40, %v325_v8 }
  0x75   :  { %v157_v45 = vsel %vm155_vm13, %v323_v37, %v156_v41  ;;  %v262_v46 = vsel %vm260_vm14, %v323_v37, %v156_v41 }
  0x76   :  { %v161_v47 = vsel %vm154_vm15, %v157_v45, %v160_v42  ;;  %v266_v48 = vsel %vm259_vm0, %v262_v46, %v265_v43 }
  0x77   :  { %v162_v49 = vsel %vm152_vm1, nan, %v161_v47  ;;  %v267_v50 = vsel %vm152_vm1, nan, %v266_v48 }
  0x78   :  { %v163_v51 = vmul.f32 %v162_v49, %v58_v44  ;;  %v268_v52 = vmul.f32 %v267_v50, %v58_v44 }
  0x7a   :  { %v271_v55 = vadd.f32 1.0, %v163_v51  ;;  %v274_v56 = vadd.f32 1.0, %v268_v52 }
  0x7c   :  { %v272_v57 = vmul.f32 %v271_v55, %v269_v53  ;;  %v275_v58 = vmul.f32 %v274_v56, %v270_v54 }
  0x7e   :  { %273 = vst [vmem:[#allocation7] sm:$0xff] %v272_v57  ;;  %276 = vst [vmem:[#allocation7 + $0x8] sm:$0xff] %v275_v58 }
  0x7f   :  { %377 = shalt.err (!%p374_p0)
}
  0x80   :  { %288 = dma.vmem_to_hbm [thread:$0]  %s283_s1, 256, %s459_s2, [#allocation4], %s393_s12, %s393_s12, %s394_s13  }
  0x81   :  { %390 = dma.done.wait [#allocation4], 256  }
  0x82   :  { %391 = vsyncadd [#allocation4], 4294967040 }
  0x83   :  { %292 = vsyncpa [#allocation3], 1 }
  0x84   :  { %293 = vsyncpa [#allocation6], 1 }
  0x85   :  { %294 = vsyncpa [#allocation4], 1 }

</bundles_post_ra>
